<compile_context>
chip_gen: v7x
topology: tpu7x:2x2x1
jax: 0.10.0
libtpu: 0.0.40
codegen_flags: <defaults>
</compile_context>

<pallas_src>
import jax
import jax.numpy as jnp
from jax.experimental import pallas as pl
from jax.experimental.pallas import tpu as pltpu


# ----------------------------------------------------------------------------
# Module config (small synthetic sizes consistent with BaseTransform.__init__)
# ----------------------------------------------------------------------------
IN_CHANNELS = 16
OUT_CHANNELS = 32                      # self.C
IMAGE_SIZE = (32, 32)                  # (iH, iW)
FEATURE_SIZE = (8, 8)                  # (fH, fW)
XBOUND = (-8.0, 8.0, 1.0)              # -> nx0 = 16
YBOUND = (-8.0, 8.0, 1.0)              # -> nx1 = 16
ZBOUND = (-10.0, 10.0, 20.0)           # -> nz  = 1
DBOUND = (1.0, 9.0, 2.0)               # -> D   = 4

# Padded feature rows for the pooling matmul rhs: [Cin | ones (count for bias) | 0-pad].
# Padding to a full 128 lanes keeps the finalize transpose on natively aligned (8,128)
# tiles.  TODO(synk): at production channel counts (>=128 in BEVFusion) drop the pad.
CPAD = 128


def gen_dx_bx(xbound, ybound, zbound):
    rows = [xbound, ybound, zbound]
    dx = jnp.array([r[2] for r in rows], jnp.float32)
    bx = jnp.array([r[0] + r[2] / 2.0 for r in rows], jnp.float32)
    nx = tuple(int((r[1] - r[0]) / r[2]) for r in rows)
    return dx, bx, nx


def create_frustum():
    iH, iW = IMAGE_SIZE
    fH, fW = FEATURE_SIZE
    ds = jnp.arange(DBOUND[0], DBOUND[1], DBOUND[2], dtype=jnp.float32)
    D = ds.shape[0]
    ds = jnp.broadcast_to(ds.reshape(D, 1, 1), (D, fH, fW))
    xs = jnp.broadcast_to(
        jnp.linspace(0.0, iW - 1, fW, dtype=jnp.float32).reshape(1, 1, fW), (D, fH, fW))
    ys = jnp.broadcast_to(
        jnp.linspace(0.0, iH - 1, fH, dtype=jnp.float32).reshape(1, fH, 1), (D, fH, fW))
    return jnp.stack([xs, ys, ds], axis=-1)  # (D, fH, fW, 3)


# ----------------------------------------------------------------------------
# Pallas kernel 1: fused frustum -> lidar geometry -> flat voxel index (int32)
# ----------------------------------------------------------------------------
def geom_voxel_idx_pallas(planes, ds, *, nx, dx, off):
    """Flat int32 BEV voxel index per frustum point (-1 = out of bounds).

    planes : (27, Rp, 128) f32 per-point parameter planes, point order (cam, h, w)
             within one depth slice:
               0: pixel u, 1: pixel v,
               2-10 : inv(post_rots) row-major,
               11-19: extra_rots @ cam2lidar_rots @ inv(intrins) row-major,
               20-22: post_trans,
               23-25: extra_rots @ cam2lidar_trans + extra_trans,
               26   : batch index (as float).
    ds     : (D,) f32 frustum depth-bin values (SMEM scalars).
    out    : (D, Rp, 128) int32 in global point order (d, cam, h, w), lane-dense.
    """
    D = ds.shape[0]
    _, Rp, _ = planes.shape
    nx0, nx1, nz = nx
    inv_dx = tuple(1.0 / float(v) for v in dx)
    offs = tuple(float(v) for v in off)

    def kernel(ds_ref, prm_ref, idx_ref):
        d = pl.program_id(0)                      # top level: safe in interpret mode
        depth = ds_ref[d]

        def P(i):                                 # parameter plane i, (Rp, 128)
            return prm_ref[i]

        px = P(0) - P(20)
        py = P(1) - P(21)
        pz = depth - P(22)
        q0 = P(2) * px + P(3) * py + P(4) * pz
        q1 = P(5) * px + P(6) * py + P(7) * pz
        q2 = P(8) * px + P(9) * py + P(10) * pz
        r0 = q0 * q2
        r1 = q1 * q2
        gx = P(11) * r0 + P(12) * r1 + P(13) * q2 + P(23)
        gy = P(14) * r0 + P(15) * r1 + P(16) * q2 + P(24)
        gz = P(17) * r0 + P(18) * r1 + P(19) * q2 + P(25)

        # torch .long() truncates toward zero; so does the f32->i32 cast.
        cx = ((gx - offs[0]) * inv_dx[0]).astype(jnp.int32)
        cy = ((gy - offs[1]) * inv_dx[1]).astype(jnp.int32)
        cz = ((gz - offs[2]) * inv_dx[2]).astype(jnp.int32)
        kept = ((cx >= 0) & (cx < nx0) & (cy >= 0) & (cy < nx1) &
                (cz >= 0) & (cz < nz))
        bi = P(26).astype(jnp.int32)
        flat = ((bi * nz + cz) * nx0 + cx) * nx1 + cy
        idx_ref[0] = jnp.where(kept, flat, -1)

    return pl.pallas_call(
        kernel,
        out_shape=jax.ShapeDtypeStruct((D, Rp, 128), jnp.int32),
        grid=(D,),
        in_specs=[
            pl.BlockSpec(memory_space=pltpu.MemorySpace.SMEM),       # ds
            pl.BlockSpec((27, Rp, 128), lambda d: (0, 0, 0)),        # planes (resident)
        ],
        out_specs=pl.BlockSpec((1, Rp, 128), lambda d: (d, 0, 0)),
        compiler_params=pltpu.CompilerParams(
            dimension_semantics=("parallel",)),
    )(ds, planes)


# ----------------------------------------------------------------------------
# Pallas kernel 2: bev_pool scatter-sum (bf16 one-hot MXU matmul) + fused projection
# ----------------------------------------------------------------------------
def bev_pool_project_pallas(idx, x_pix, wT_aug, n_vox, *, tv, tp):
    """Pool pixel channels into voxels, then project with the augmented weight.

    idx    : (S, Rt, 128) int32 flat voxel index per point (-1 = dropped), global
             point order (d, cam, h, w); tp = Rt*128 points per reduction step.
    x_pix  : (npix, CPAD) bf16 pixel features; column IN_CHANNELS is all ones (the
             per-voxel point count for the bias term), remaining columns zero.
    wT_aug : (C, CPAD) f32 == [W; b; 0]^T.
    returns: (C, n_vox) f32, lane-dense.
    """
    S, Rt, _ = idx.shape
    npix, cpad = x_pix.shape
    C = wT_aug.shape[0]
    assert tp == Rt * 128
    assert n_vox % tv == 0 and tv % 128 == 0
    assert npix % tp == 0
    pix_blocks = npix // tp
    grid = (n_vox // tv, S)                       # >=2 parallel voxel tiles for v7x

    if pix_blocks == 1:
        x_index_map = lambda v, p: (0, 0)
    else:
        # TODO(synk): at production sizes reorder points pixel-major (or Buffered(3))
        # so each pixel slab is DMA'd once instead of D times across the reduction.
        x_index_map = lambda v, p: (p % pix_blocks, 0)

    def kernel(idx_ref, x_ref, wT_ref, out_ref, acc_ref):
        v = pl.program_id(0)                      # all grid queries at top level so the
        p = pl.program_id(1)                      # pl.when bodies only close over values
        last_p = pl.num_programs(1) - 1

        @pl.when(p == 0)
        def _init():
            acc_ref[...] = jnp.zeros_like(acc_ref)

        # voxel ids of this tile, regenerated per step (VPU iota is essentially free)
        vox_id = jax.lax.broadcasted_iota(jnp.int32, (tv, 128), 0) + v * tv
        idx_blk = idx_ref[0]                      # (Rt, 128) int32, lane-dense

        for r in range(Rt):                       # 128-point K-chunks: bf16 one-hot
            row = idx_blk[r:r + 1, :]             # (1, 128) stays vreg-resident
            onehot = (vox_id == row).astype(jnp.bfloat16)          # (tv, 128)
            xr = x_ref[r * 128:(r + 1) * 128, :]                   # (128, CPAD) bf16
            acc_ref[...] += jnp.dot(onehot, xr,
                                    preferred_element_type=jnp.float32)

        @pl.when(p == last_p)
        def _fin():
            # fused 1x1 projection: (C, CPAD) @ (CPAD, tv) -> lane-dense (C, tv)
            out_ref[...] = jnp.dot(wT_ref[...], acc_ref[...].T,
                                   preferred_element_type=jnp.float32)

    return pl.pallas_call(
        kernel,
        out_shape=jax.ShapeDtypeStruct((C, n_vox), jnp.float32),
        grid=grid,
        in_specs=[
            pl.BlockSpec((1, Rt, 128), lambda v, p: (p, 0, 0)),    # idx, lane-dense
            pl.BlockSpec((tp, cpad), x_index_map),                 # pixel features
            pl.BlockSpec((C, cpad), lambda v, p: (0, 0)),          # W_aug^T (resident)
        ],
        out_specs=pl.BlockSpec((C, tv), lambda v, p: (0, v)),
        scratch_shapes=[pltpu.VMEM((tv, cpad), jnp.float32)],
        compiler_params=pltpu.CompilerParams(
            dimension_semantics=("parallel", "arbitrary")),
    )(idx, x_pix, wT_aug)


# ----------------------------------------------------------------------------
# BaseTransform in JAX (glue around the Pallas kernels)
# ----------------------------------------------------------------------------
class BaseTransformPallas:
    def __init__(self):
        self.in_channels = IN_CHANNELS
        self.C = OUT_CHANNELS
        self.image_size = IMAGE_SIZE
        self.feature_size = FEATURE_SIZE
        self.dx, self.bx, self.nx = gen_dx_bx(XBOUND, YBOUND, ZBOUND)
        self.frustum = create_frustum()
        self.D = self.frustum.shape[0]
        # TODO(synk): BaseTransform.get_cam_feats raises NotImplementedError (abstract);
        # a deterministic 1x1-conv projection broadcast over depth bins stands in for it
        # and is folded algebraically into the pooling kernel's finalize step.
        kw, kb = jax.random.split(jax.random.PRNGKey(42))
        self.w_proj = (jax.random.normal(kw, (IN_CHANNELS, OUT_CHANNELS), jnp.float32)
                       * 0.1)
        self.b_proj = jax.random.normal(kb, (1, OUT_CHANNELS), jnp.float32) * 0.01
        # fused/padded projection weight: rows = [W (Cin); b (1); zeros (pad to CPAD)]
        w_aug = jnp.concatenate(
            [self.w_proj, self.b_proj,
             jnp.zeros((CPAD - IN_CHANNELS - 1, OUT_CHANNELS), jnp.float32)], axis=0)
        self.wT_aug = w_aug.T                                      # (C, CPAD)
        # frustum constants: depth-bin values and per-pixel image-plane coords
        self.ds = self.frustum[:, 0, 0, 2]                          # (D,)
        self.uv = self.frustum[0, :, :, :2].reshape(-1, 2)          # (fH*fW, 2)

    # --------------------------------------------------------------
    def forward(self, img, points, lidar2image, camera_intrinsics, camera2lidar,
                img_aug_matrix, lidar_aug_matrix, metas):
        intrins = camera_intrinsics[..., :3, :3]
        post_rots = img_aug_matrix[..., :3, :3]
        post_trans = img_aug_matrix[..., :3, 3]
        c2l_rots = camera2lidar[..., :3, :3]
        c2l_trans = camera2lidar[..., :3, 3]
        extra_rots = lidar_aug_matrix[..., :3, :3]
        extra_trans = lidar_aug_matrix[..., :3, 3]

        B, N = intrins.shape[:2]
        fH, fW = self.feature_size
        HW = fH * fW
        BN = B * N
        npix = BN * HW
        nprime = self.D * npix
        nx0, nx1, nz = self.nx
        assert npix % 128 == 0
        Rp = npix // 128

        # tiny 3x3 glue (torch.inverse equivalents) stays in plain JAX
        M1 = jnp.linalg.inv(post_rots)                               # (B,N,3,3)
        combine = c2l_rots @ jnp.linalg.inv(intrins)                 # (B,N,3,3)
        M2 = jnp.einsum("bij,bnjk->bnik", extra_rots, combine)       # (B,N,3,3)
        t2 = (jnp.einsum("bij,bnj->bni", extra_rots, c2l_trans)
              + extra_trans[:, None, :])                             # (B,N,3)

        # per-camera scalar table -> per-point parameter planes (27 * npix * 4 B)
        bix = jnp.repeat(jnp.arange(B, dtype=jnp.float32), N).reshape(BN, 1)
        cam_tab = jnp.concatenate(
            [M1.reshape(BN, 9), M2.reshape(BN, 9),
             post_trans.reshape(BN, 3), t2.reshape(BN, 3), bix], axis=1)   # (BN, 25)
        pt_tab = jnp.concatenate(
            [jnp.tile(self.uv, (BN, 1)), jnp.repeat(cam_tab, HW, axis=0)],
            axis=1)                                                  # (npix, 27)
        planes = pt_tab.T.reshape(27, Rp, 128).astype(jnp.float32)

        # kernel 1: per-point flat voxel index, global (d, cam, h, w) order, lane-dense
        off = self.bx - self.dx / 2.0
        idx = geom_voxel_idx_pallas(
            planes, self.ds, nx=self.nx,
            dx=(XBOUND[2], YBOUND[2], ZBOUND[2]),
            off=(float(off[0]), float(off[1]), float(off[2])))       # (D, Rp, 128)

        # pixel-major features + ones column (count for the bias) + zero pad, bf16
        # TODO(synk): at production feature sizes fold this channel-last relayout into
        # kernel 2's feature BlockSpec instead of doing it in XLA.
        x_pix = (img.astype(jnp.float32)
                 .transpose(0, 1, 3, 4, 2).reshape(npix, self.in_channels))
        x_pix = jnp.concatenate(
            [x_pix, jnp.ones((npix, 1), jnp.float32),
             jnp.zeros((npix, CPAD - self.in_channels - 1), jnp.float32)], axis=1)
        x_pix = x_pix.astype(jnp.bfloat16)                           # (npix, CPAD)

        n_vox = B * nz * nx0 * nx1
        tv = 256 if n_vox % 256 == 0 else 128                        # >=2 tiles for v7x
        tp = min(npix, 256)
        idx2 = idx.reshape(nprime // tp, tp // 128, 128)             # free regroup
        pooled = bev_pool_project_pallas(idx2, x_pix, self.wT_aug, n_vox,
                                         tv=tv, tp=tp)               # (C, n_vox)

        # torch: (B,C,nz,nx0,nx1) -> unbind(z) -> cat(dim=1) == (B, nz*C, nx0, nx1)
        out = pooled.reshape(self.C, B, nz, nx0, nx1).transpose(1, 2, 0, 3, 4)
        return out.reshape(B, nz * self.C, nx0, nx1)


# ----------------------------------------------------------------------------
# Pure-JAX reference (mirrors the PyTorch code, op for op) for validation
# ----------------------------------------------------------------------------
def reference_forward(m, img, camera_intrinsics, camera2lidar, img_aug_matrix,
                      lidar_aug_matrix):
    intrins = camera_intrinsics[..., :3, :3]
    post_rots = img_aug_matrix[..., :3, :3]
    post_trans = img_aug_matrix[..., :3, 3]
    c2l_rots = camera2lidar[..., :3, :3]
    c2l_trans = camera2lidar[..., :3, 3]
    extra_rots = lidar_aug_matrix[..., :3, :3]
    extra_trans = lidar_aug_matrix[..., :3, 3]
    B, N = intrins.shape[:2]

    pts = m.frustum[None, None] - post_trans[:, :, None, None, None, :]
    pts = jnp.einsum("bnij,bndhwj->bndhwi", jnp.linalg.inv(post_rots), pts)
    pts = jnp.concatenate([pts[..., :2] * pts[..., 2:3], pts[..., 2:3]], -1)
    combine = c2l_rots @ jnp.linalg.inv(intrins)
    pts = jnp.einsum("bnij,bndhwj->bndhwi", combine, pts)
    pts = pts + c2l_trans[:, :, None, None, None, :]
    pts = jnp.einsum("bij,bndhwj->bndhwi", extra_rots, pts)
    geom = pts + extra_trans[:, None, None, None, None, :]

    feats = jnp.einsum("bnchw,ck->bnhwk", img, m.w_proj) + m.b_proj[0]
    x = jnp.broadcast_to(feats[:, :, None],
                         (B, N, m.D) + feats.shape[2:])              # (B,N,D,H,W,C)

    nx0, nx1, nz = m.nx
    nprime = B * N * m.D * m.feature_size[0] * m.feature_size[1]
    x_flat = x.reshape(nprime, m.C)
    coords = ((geom - (m.bx - m.dx / 2.0)) / m.dx).astype(jnp.int32).reshape(nprime, 3)
    batch_ix = jnp.repeat(jnp.arange(B, dtype=jnp.int32), nprime // B)
    kept = ((coords[:, 0] >= 0) & (coords[:, 0] < nx0) &
            (coords[:, 1] >= 0) & (coords[:, 1] < nx1) &
            (coords[:, 2] >= 0) & (coords[:, 2] < nz))
    n_vox = B * nz * nx0 * nx1
    flat_idx = (((batch_ix * nz + coords[:, 2]) * nx0 + coords[:, 0]) * nx1
                + coords[:, 1])
    seg = jnp.where(kept, flat_idx, n_vox)
    pooled = jax.ops.segment_sum(x_flat, seg, num_segments=n_vox + 1)[:n_vox]
    out5 = pooled.reshape(B, nz, nx0, nx1, m.C)
    return out5.transpose(0, 1, 4, 2, 3).reshape(B, nz * m.C, nx0, nx1)


# ----------------------------------------------------------------------------
if __name__ == "__main__":
    B, N = 2, 2
    fH, fW = FEATURE_SIZE
    iH, iW = IMAGE_SIZE
    key = jax.random.PRNGKey(0)
    k_img, k_int, k_c2l, k_ida, k_bda = jax.random.split(key, 5)

    img = jax.random.normal(k_img, (B, N, IN_CHANNELS, fH, fW), jnp.float32) * 0.1

    eye4 = jnp.broadcast_to(jnp.eye(4, dtype=jnp.float32), (B, N, 4, 4))
    intr = eye4.at[..., 0, 0].set(float(iW)) \
               .at[..., 1, 1].set(float(iH)) \
               .at[..., 0, 2].set(iW / 2.0) \
               .at[..., 1, 2].set(iH / 2.0)
    camera_intrinsics = intr + jax.random.normal(k_int, (B, N, 4, 4)) * 0.01 * \
        jnp.pad(jnp.ones((3, 3)), ((0, 1), (0, 1)))
    camera2lidar = eye4.at[..., :3, :3].add(
        jax.random.normal(k_c2l, (B, N, 3, 3)) * 0.05
    ).at[..., :3, 3].set(jax.random.normal(k_c2l, (B, N, 3)) * 0.5)
    img_aug_matrix = eye4.at[..., :3, :3].add(
        jax.random.normal(k_ida, (B, N, 3, 3)) * 0.02
    ).at[..., :3, 3].set(jax.random.normal(k_ida, (B, N, 3)) * 1.0)
    lidar_aug_matrix = jnp.broadcast_to(jnp.eye(4, dtype=jnp.float32), (B, 4, 4)) \
        .at[:, :3, :3].add(jax.random.normal(k_bda, (B, 3, 3)) * 0.02) \
        .at[:, :3, 3].set(jax.random.normal(k_bda, (B, 3)) * 0.2)

    module = BaseTransformPallas()
    out = module.forward(img, None, None, camera_intrinsics, camera2lidar,
                         img_aug_matrix, lidar_aug_matrix, metas=None)
    out = jax.block_until_ready(out)

    nx0, nx1, nz = module.nx
    assert out.shape == (B, nz * OUT_CHANNELS, nx0, nx1), out.shape

    ref = jax.block_until_ready(
        reference_forward(module, img, camera_intrinsics, camera2lidar,
                          img_aug_matrix, lidar_aug_matrix))
    # bf16 feature operands in the pooling matmul (f32 accumulation) -> ~1e-3 abs error
    max_err = float(jnp.max(jnp.abs(out - ref)))
    assert jnp.allclose(out, ref, atol=1e-2, rtol=1e-2), max_err

    print("KERNEL_OK")
</pallas_src>

<mosaic_0001>
module attributes {stable_mosaic.version = 11 : i64} {
  func.func @kernel(%arg0: i32, %arg1: memref<4xf32, #tpu.memory_space<smem>>, %arg2: memref<27x2x128xf32, #tpu.memory_space<vmem>>, %arg3: memref<1x2x128xi32, #tpu.memory_space<vmem>>) attributes {dimension_semantics = [#tpu.dimension_semantics<parallel>], iteration_bounds = array<i64: 4>, scalar_prefetch = 0 : i64, scratch_operands = 0 : i64, tpu.core_type = #tpu.core_type<tc>, window_params = [{transform_indices = @transform_0, window_bounds = array<i64: 4>}, {pipeline_mode = #tpu.pipeline_mode<synchronous>, transform_indices = @transform_1, window_bounds = array<i64: 27, 2, 128>}, {transform_indices = @transform_2, window_bounds = array<i64: 1, 2, 128>}]} {
    %0 = arith.index_cast %arg0 : i32 to index
    %1 = memref.load %arg1[%0] : memref<4xf32, #tpu.memory_space<smem>>
    %c0 = arith.constant 0 : index
    %c0_0 = arith.constant 0 : index
    %c0_1 = arith.constant 0 : index
    %2 = vector.load %arg2[%c0, %c0_0, %c0_1] : memref<27x2x128xf32, #tpu.memory_space<vmem>>, vector<1x2x128xf32>
    %3 = vector.shape_cast %2 : vector<1x2x128xf32> to vector<2x128xf32>
    %c20 = arith.constant 20 : index
    %c0_2 = arith.constant 0 : index
    %c0_3 = arith.constant 0 : index
    %4 = vector.load %arg2[%c20, %c0_2, %c0_3] : memref<27x2x128xf32, #tpu.memory_space<vmem>>, vector<1x2x128xf32>
    %5 = vector.shape_cast %4 : vector<1x2x128xf32> to vector<2x128xf32>
    %6 = arith.subf %3, %5 : vector<2x128xf32>
    %c1 = arith.constant 1 : index
    %c0_4 = arith.constant 0 : index
    %c0_5 = arith.constant 0 : index
    %7 = vector.load %arg2[%c1, %c0_4, %c0_5] : memref<27x2x128xf32, #tpu.memory_space<vmem>>, vector<1x2x128xf32>
    %8 = vector.shape_cast %7 : vector<1x2x128xf32> to vector<2x128xf32>
    %c21 = arith.constant 21 : index
    %c0_6 = arith.constant 0 : index
    %c0_7 = arith.constant 0 : index
    %9 = vector.load %arg2[%c21, %c0_6, %c0_7] : memref<27x2x128xf32, #tpu.memory_space<vmem>>, vector<1x2x128xf32>
    %10 = vector.shape_cast %9 : vector<1x2x128xf32> to vector<2x128xf32>
    %11 = arith.subf %8, %10 : vector<2x128xf32>
    %c22 = arith.constant 22 : index
    %c0_8 = arith.constant 0 : index
    %c0_9 = arith.constant 0 : index
    %12 = vector.load %arg2[%c22, %c0_8, %c0_9] : memref<27x2x128xf32, #tpu.memory_space<vmem>>, vector<1x2x128xf32>
    %13 = vector.shape_cast %12 : vector<1x2x128xf32> to vector<2x128xf32>
    %14 = vector.broadcast %1 : f32 to vector<2x128xf32>
    %15 = arith.subf %14, %13 : vector<2x128xf32>
    %c2 = arith.constant 2 : index
    %c0_10 = arith.constant 0 : index
    %c0_11 = arith.constant 0 : index
    %16 = vector.load %arg2[%c2, %c0_10, %c0_11] : memref<27x2x128xf32, #tpu.memory_space<vmem>>, vector<1x2x128xf32>
    %17 = vector.shape_cast %16 : vector<1x2x128xf32> to vector<2x128xf32>
    %18 = arith.mulf %17, %6 : vector<2x128xf32>
    %c3 = arith.constant 3 : index
    %c0_12 = arith.constant 0 : index
    %c0_13 = arith.constant 0 : index
    %19 = vector.load %arg2[%c3, %c0_12, %c0_13] : memref<27x2x128xf32, #tpu.memory_space<vmem>>, vector<1x2x128xf32>
    %20 = vector.shape_cast %19 : vector<1x2x128xf32> to vector<2x128xf32>
    %21 = arith.mulf %20, %11 : vector<2x128xf32>
    %22 = arith.addf %18, %21 : vector<2x128xf32>
    %c4 = arith.constant 4 : index
    %c0_14 = arith.constant 0 : index
    %c0_15 = arith.constant 0 : index
    %23 = vector.load %arg2[%c4, %c0_14, %c0_15] : memref<27x2x128xf32, #tpu.memory_space<vmem>>, vector<1x2x128xf32>
    %24 = vector.shape_cast %23 : vector<1x2x128xf32> to vector<2x128xf32>
    %25 = arith.mulf %24, %15 : vector<2x128xf32>
    %26 = arith.addf %22, %25 : vector<2x128xf32>
    %c5 = arith.constant 5 : index
    %c0_16 = arith.constant 0 : index
    %c0_17 = arith.constant 0 : index
    %27 = vector.load %arg2[%c5, %c0_16, %c0_17] : memref<27x2x128xf32, #tpu.memory_space<vmem>>, vector<1x2x128xf32>
    %28 = vector.shape_cast %27 : vector<1x2x128xf32> to vector<2x128xf32>
    %29 = arith.mulf %28, %6 : vector<2x128xf32>
    %c6 = arith.constant 6 : index
    %c0_18 = arith.constant 0 : index
    %c0_19 = arith.constant 0 : index
    %30 = vector.load %arg2[%c6, %c0_18, %c0_19] : memref<27x2x128xf32, #tpu.memory_space<vmem>>, vector<1x2x128xf32>
    %31 = vector.shape_cast %30 : vector<1x2x128xf32> to vector<2x128xf32>
    %32 = arith.mulf %31, %11 : vector<2x128xf32>
    %33 = arith.addf %29, %32 : vector<2x128xf32>
    %c7 = arith.constant 7 : index
    %c0_20 = arith.constant 0 : index
    %c0_21 = arith.constant 0 : index
    %34 = vector.load %arg2[%c7, %c0_20, %c0_21] : memref<27x2x128xf32, #tpu.memory_space<vmem>>, vector<1x2x128xf32>
    %35 = vector.shape_cast %34 : vector<1x2x128xf32> to vector<2x128xf32>
    %36 = arith.mulf %35, %15 : vector<2x128xf32>
    %37 = arith.addf %33, %36 : vector<2x128xf32>
    %c8 = arith.constant 8 : index
    %c0_22 = arith.constant 0 : index
    %c0_23 = arith.constant 0 : index
    %38 = vector.load %arg2[%c8, %c0_22, %c0_23] : memref<27x2x128xf32, #tpu.memory_space<vmem>>, vector<1x2x128xf32>
    %39 = vector.shape_cast %38 : vector<1x2x128xf32> to vector<2x128xf32>
    %40 = arith.mulf %39, %6 : vector<2x128xf32>
    %c9 = arith.constant 9 : index
    %c0_24 = arith.constant 0 : index
    %c0_25 = arith.constant 0 : index
    %41 = vector.load %arg2[%c9, %c0_24, %c0_25] : memref<27x2x128xf32, #tpu.memory_space<vmem>>, vector<1x2x128xf32>
    %42 = vector.shape_cast %41 : vector<1x2x128xf32> to vector<2x128xf32>
    %43 = arith.mulf %42, %11 : vector<2x128xf32>
    %44 = arith.addf %40, %43 : vector<2x128xf32>
    %c10 = arith.constant 10 : index
    %c0_26 = arith.constant 0 : index
    %c0_27 = arith.constant 0 : index
    %45 = vector.load %arg2[%c10, %c0_26, %c0_27] : memref<27x2x128xf32, #tpu.memory_space<vmem>>, vector<1x2x128xf32>
    %46 = vector.shape_cast %45 : vector<1x2x128xf32> to vector<2x128xf32>
    %47 = arith.mulf %46, %15 : vector<2x128xf32>
    %48 = arith.addf %44, %47 : vector<2x128xf32>
    %49 = arith.mulf %26, %48 : vector<2x128xf32>
    %50 = arith.mulf %37, %48 : vector<2x128xf32>
    %c11 = arith.constant 11 : index
    %c0_28 = arith.constant 0 : index
    %c0_29 = arith.constant 0 : index
    %51 = vector.load %arg2[%c11, %c0_28, %c0_29] : memref<27x2x128xf32, #tpu.memory_space<vmem>>, vector<1x2x128xf32>
    %52 = vector.shape_cast %51 : vector<1x2x128xf32> to vector<2x128xf32>
    %53 = arith.mulf %52, %49 : vector<2x128xf32>
    %c12 = arith.constant 12 : index
    %c0_30 = arith.constant 0 : index
    %c0_31 = arith.constant 0 : index
    %54 = vector.load %arg2[%c12, %c0_30, %c0_31] : memref<27x2x128xf32, #tpu.memory_space<vmem>>, vector<1x2x128xf32>
    %55 = vector.shape_cast %54 : vector<1x2x128xf32> to vector<2x128xf32>
    %56 = arith.mulf %55, %50 : vector<2x128xf32>
    %57 = arith.addf %53, %56 : vector<2x128xf32>
    %c13 = arith.constant 13 : index
    %c0_32 = arith.constant 0 : index
    %c0_33 = arith.constant 0 : index
    %58 = vector.load %arg2[%c13, %c0_32, %c0_33] : memref<27x2x128xf32, #tpu.memory_space<vmem>>, vector<1x2x128xf32>
    %59 = vector.shape_cast %58 : vector<1x2x128xf32> to vector<2x128xf32>
    %60 = arith.mulf %59, %48 : vector<2x128xf32>
    %61 = arith.addf %57, %60 : vector<2x128xf32>
    %c23 = arith.constant 23 : index
    %c0_34 = arith.constant 0 : index
    %c0_35 = arith.constant 0 : index
    %62 = vector.load %arg2[%c23, %c0_34, %c0_35] : memref<27x2x128xf32, #tpu.memory_space<vmem>>, vector<1x2x128xf32>
    %63 = vector.shape_cast %62 : vector<1x2x128xf32> to vector<2x128xf32>
    %64 = arith.addf %61, %63 : vector<2x128xf32>
    %c14 = arith.constant 14 : index
    %c0_36 = arith.constant 0 : index
    %c0_37 = arith.constant 0 : index
    %65 = vector.load %arg2[%c14, %c0_36, %c0_37] : memref<27x2x128xf32, #tpu.memory_space<vmem>>, vector<1x2x128xf32>
    %66 = vector.shape_cast %65 : vector<1x2x128xf32> to vector<2x128xf32>
    %67 = arith.mulf %66, %49 : vector<2x128xf32>
    %c15 = arith.constant 15 : index
    %c0_38 = arith.constant 0 : index
    %c0_39 = arith.constant 0 : index
    %68 = vector.load %arg2[%c15, %c0_38, %c0_39] : memref<27x2x128xf32, #tpu.memory_space<vmem>>, vector<1x2x128xf32>
    %69 = vector.shape_cast %68 : vector<1x2x128xf32> to vector<2x128xf32>
    %70 = arith.mulf %69, %50 : vector<2x128xf32>
    %71 = arith.addf %67, %70 : vector<2x128xf32>
    %c16 = arith.constant 16 : index
    %c0_40 = arith.constant 0 : index
    %c0_41 = arith.constant 0 : index
    %72 = vector.load %arg2[%c16, %c0_40, %c0_41] : memref<27x2x128xf32, #tpu.memory_space<vmem>>, vector<1x2x128xf32>
    %73 = vector.shape_cast %72 : vector<1x2x128xf32> to vector<2x128xf32>
    %74 = arith.mulf %73, %48 : vector<2x128xf32>
    %75 = arith.addf %71, %74 : vector<2x128xf32>
    %c24 = arith.constant 24 : index
    %c0_42 = arith.constant 0 : index
    %c0_43 = arith.constant 0 : index
    %76 = vector.load %arg2[%c24, %c0_42, %c0_43] : memref<27x2x128xf32, #tpu.memory_space<vmem>>, vector<1x2x128xf32>
    %77 = vector.shape_cast %76 : vector<1x2x128xf32> to vector<2x128xf32>
    %78 = arith.addf %75, %77 : vector<2x128xf32>
    %c17 = arith.constant 17 : index
    %c0_44 = arith.constant 0 : index
    %c0_45 = arith.constant 0 : index
    %79 = vector.load %arg2[%c17, %c0_44, %c0_45] : memref<27x2x128xf32, #tpu.memory_space<vmem>>, vector<1x2x128xf32>
    %80 = vector.shape_cast %79 : vector<1x2x128xf32> to vector<2x128xf32>
    %81 = arith.mulf %80, %49 : vector<2x128xf32>
    %c18 = arith.constant 18 : index
    %c0_46 = arith.constant 0 : index
    %c0_47 = arith.constant 0 : index
    %82 = vector.load %arg2[%c18, %c0_46, %c0_47] : memref<27x2x128xf32, #tpu.memory_space<vmem>>, vector<1x2x128xf32>
    %83 = vector.shape_cast %82 : vector<1x2x128xf32> to vector<2x128xf32>
    %84 = arith.mulf %83, %50 : vector<2x128xf32>
    %85 = arith.addf %81, %84 : vector<2x128xf32>
    %c19 = arith.constant 19 : index
    %c0_48 = arith.constant 0 : index
    %c0_49 = arith.constant 0 : index
    %86 = vector.load %arg2[%c19, %c0_48, %c0_49] : memref<27x2x128xf32, #tpu.memory_space<vmem>>, vector<1x2x128xf32>
    %87 = vector.shape_cast %86 : vector<1x2x128xf32> to vector<2x128xf32>
    %88 = arith.mulf %87, %48 : vector<2x128xf32>
    %89 = arith.addf %85, %88 : vector<2x128xf32>
    %c25 = arith.constant 25 : index
    %c0_50 = arith.constant 0 : index
    %c0_51 = arith.constant 0 : index
    %90 = vector.load %arg2[%c25, %c0_50, %c0_51] : memref<27x2x128xf32, #tpu.memory_space<vmem>>, vector<1x2x128xf32>
    %91 = vector.shape_cast %90 : vector<1x2x128xf32> to vector<2x128xf32>
    %92 = arith.addf %89, %91 : vector<2x128xf32>
    %cst = arith.constant -8.000000e+00 : f32
    %93 = vector.broadcast %cst : f32 to vector<2x128xf32>
    %94 = arith.subf %64, %93 : vector<2x128xf32>
    %cst_52 = arith.constant 1.000000e+00 : f32
    %95 = vector.broadcast %cst_52 : f32 to vector<2x128xf32>
    %96 = arith.mulf %94, %95 : vector<2x128xf32>
    %97 = arith.fptosi %96 : vector<2x128xf32> to vector<2x128xi32>
    %cst_53 = arith.constant -8.000000e+00 : f32
    %98 = vector.broadcast %cst_53 : f32 to vector<2x128xf32>
    %99 = arith.subf %78, %98 : vector<2x128xf32>
    %cst_54 = arith.constant 1.000000e+00 : f32
    %100 = vector.broadcast %cst_54 : f32 to vector<2x128xf32>
    %101 = arith.mulf %99, %100 : vector<2x128xf32>
    %102 = arith.fptosi %101 : vector<2x128xf32> to vector<2x128xi32>
    %cst_55 = arith.constant -1.000000e+01 : f32
    %103 = vector.broadcast %cst_55 : f32 to vector<2x128xf32>
    %104 = arith.subf %92, %103 : vector<2x128xf32>
    %cst_56 = arith.constant 5.000000e-02 : f32
    %105 = vector.broadcast %cst_56 : f32 to vector<2x128xf32>
    %106 = arith.mulf %104, %105 : vector<2x128xf32>
    %107 = arith.fptosi %106 : vector<2x128xf32> to vector<2x128xi32>
    %c0_i32 = arith.constant 0 : i32
    %108 = vector.broadcast %c0_i32 : i32 to vector<2x128xi32>
    %109 = arith.cmpi sge, %97, %108 : vector<2x128xi32>
    %c16_i32 = arith.constant 16 : i32
    %110 = vector.broadcast %c16_i32 : i32 to vector<2x128xi32>
    %111 = arith.cmpi slt, %97, %110 : vector<2x128xi32>
    %112 = arith.andi %109, %111 : vector<2x128xi1>
    %c0_i32_57 = arith.constant 0 : i32
    %113 = vector.broadcast %c0_i32_57 : i32 to vector<2x128xi32>
    %114 = arith.cmpi sge, %102, %113 : vector<2x128xi32>
    %115 = arith.andi %112, %114 : vector<2x128xi1>
    %c16_i32_58 = arith.constant 16 : i32
    %116 = vector.broadcast %c16_i32_58 : i32 to vector<2x128xi32>
    %117 = arith.cmpi slt, %102, %116 : vector<2x128xi32>
    %118 = arith.andi %115, %117 : vector<2x128xi1>
    %c0_i32_59 = arith.constant 0 : i32
    %119 = vector.broadcast %c0_i32_59 : i32 to vector<2x128xi32>
    %120 = arith.cmpi sge, %107, %119 : vector<2x128xi32>
    %121 = arith.andi %118, %120 : vector<2x128xi1>
    %c1_i32 = arith.constant 1 : i32
    %122 = vector.broadcast %c1_i32 : i32 to vector<2x128xi32>
    %123 = arith.cmpi slt, %107, %122 : vector<2x128xi32>
    %124 = arith.andi %121, %123 : vector<2x128xi1>
    %c26 = arith.constant 26 : index
    %c0_60 = arith.constant 0 : index
    %c0_61 = arith.constant 0 : index
    %125 = vector.load %arg2[%c26, %c0_60, %c0_61] : memref<27x2x128xf32, #tpu.memory_space<vmem>>, vector<1x2x128xf32>
    %126 = vector.shape_cast %125 : vector<1x2x128xf32> to vector<2x128xf32>
    %127 = arith.fptosi %126 : vector<2x128xf32> to vector<2x128xi32>
    %c1_i32_62 = arith.constant 1 : i32
    %128 = vector.broadcast %c1_i32_62 : i32 to vector<2x128xi32>
    %129 = arith.muli %127, %128 : vector<2x128xi32>
    %130 = arith.addi %129, %107 : vector<2x128xi32>
    %c16_i32_63 = arith.constant 16 : i32
    %131 = vector.broadcast %c16_i32_63 : i32 to vector<2x128xi32>
    %132 = arith.muli %130, %131 : vector<2x128xi32>
    %133 = arith.addi %132, %97 : vector<2x128xi32>
    %c16_i32_64 = arith.constant 16 : i32
    %134 = vector.broadcast %c16_i32_64 : i32 to vector<2x128xi32>
    %135 = arith.muli %133, %134 : vector<2x128xi32>
    %136 = arith.addi %135, %102 : vector<2x128xi32>
    %c-1_i32 = arith.constant -1 : i32
    %137 = vector.broadcast %c-1_i32 : i32 to vector<2x128xi32>
    %138 = arith.select %124, %136, %137 : vector<2x128xi1>, vector<2x128xi32>
    %c0_65 = arith.constant 0 : index
    %c0_66 = arith.constant 0 : index
    %c0_67 = arith.constant 0 : index
    %139 = vector.load %arg3[%c0_65, %c0_66, %c0_67] : memref<1x2x128xi32, #tpu.memory_space<vmem>>, vector<1x2x128xi32>
    %140 = vector.shape_cast %139 : vector<1x2x128xi32> to vector<2x128xi32>
    %141 = vector.shape_cast %138 : vector<2x128xi32> to vector<1x2x128xi32>
    tpu.vector_store %arg3[%c0_65, %c0_66, %c0_67], %141 {strides = array<i32>} : memref<1x2x128xi32, #tpu.memory_space<vmem>>, vector<1x2x128xi32>,
    return
  }
  func.func @transform_0(%arg0: i32) -> i32 {
    %c0_i32 = arith.constant 0 : i32
    %c0_i32_0 = arith.constant 0 : i32
    return %c0_i32 : i32
  }
  func.func @transform_1(%arg0: i32) -> (i32, i32, i32) {
    %c0_i32 = arith.constant 0 : i32
    %c0_i32_0 = arith.constant 0 : i32
    %c0_i32_1 = arith.constant 0 : i32
    %c0_i32_2 = arith.constant 0 : i32
    return %c0_i32, %c0_i32_0, %c0_i32_1 : i32, i32, i32
  }
  func.func @transform_2(%arg0: i32) -> (i32, i32, i32) {
    %c0_i32 = arith.constant 0 : i32
    %c0_i32_0 = arith.constant 0 : i32
    %c0_i32_1 = arith.constant 0 : i32
    return %arg0, %c0_i32, %c0_i32_0 : i32, i32, i32
  }
}

</mosaic_0001>

<bundles_post_ra>
// kernel: tpu_custom_call.1
= control target key start
LH: loop header
LB: loop body
LE: loop exit
PB: predicated region body
PF: predicated region fallthrough
CT: control target
= control target key end

     0   :  { %7 = vsyncpa [#allocation5], 0  ;;  %s736_s0 = inlined_call_operand.hbm [shape: f32[4], index: 0, kind: input, shape index: {}]   ;;  %s737_s1 = inlined_call_operand.hbm [shape: f32[27,2,128], index: 1, kind: input, shape index: {}]   ;;  %s738_s2 = inlined_call_operand.hbm [shape: s32[4,2,128], index: 2, kind: output, shape index: {}]  }
   0x1   :  { %8 = vsyncpa [#allocation3], 0 }
   0x2   :  { %9 = vsyncpa [#allocation4], 0 }
   0x3   :  { %11 = vsyncpa [#allocation4 + $0x1], 0  ;;  %s571_s9 = smov 0   ;;  %s573_s10 = smov 0  }
   0x4   :  { %s575_s11 = smov 0   ;;  %s577_s12 = smov 0  }
   0x5 LB: > { %s592_s13 = sadd.s32 4294967295, %s549_s12   ;;  %s353_s14 = sadd.s32 4294967294, %s549_s12   ;;  %s549_s12 = sphi %s577_s12, %s752_s12   ;;  %s545_s11 = sphi %s575_s11, %s751_s11   ;;  %s541_s10 = sphi %s573_s10, %s750_s10   ;;  %s537_s9 = sphi %s571_s9, %s749_s9  }
   0x6   : > { %s596_s15 = sadd.s32 1, %s549_s12   ;;  %s66_s16 = sadd.s32 1, %s545_s11 }
   0x7   : > { %s63_s17 = ssub.s32 %s549_s12, %s596_s15  ;;  %p76_p0 = scmp.ne.s32.totalorder %s545_s11, %s541_s10 }
   0x8   : > { %p64_p1 = scmp.eq.s32.totalorder %s63_s17, 0  ;;  %p77_p2 = scmp.eq.s32.totalorder %s592_s13, 3 }
   0x9   : > { %p82_p3 = scmp.ne.s32.totalorder %s541_s10, %s537_s9  ;;  %p83_p4 = scmp.eq.s32.totalorder %s353_s14, 3 }
   0xa   : > { %s607_s18 = scalar_select %p64_p1, %s545_s11, %s66_s16  }
   0xb   : > { %p609_p5 = por %p77_p2, %p76_p0  ;;  %p613_p6 = por %p83_p4, %p82_p3 }
   0xc   : > { %p354_p7 = scmp.ge.s32.totalorder %s549_s12, 1  ;;  %p90_p8 = scmp.lt.s32.totalorder %s549_s12, 5 }
   0xd   : > { %s741_s20 = scalar_select %p613_p6, 1, 0 }
   0xe   : > { %p619_p9 = pnand %p354_p7, %p90_p8  ;;  %p739_p10 = scmp.eq.s32.totalorder %s592_s13, 0 }
   0xf   : > { %s551_s22 = smov [#allocation6]   ;;  %s438_s27 = scalar_lea.hbm %s736_s0, 16 }
  0x10   : > { %p386_p11 = pneg %p619_p9  ;;  %s111_s23 = sshll.u32 %s551_s22, 4  ;;  %s632_s23 = int_to_ptr.vmem [resolvable:$true] %s111_s23 }
  0x11   : > { %p439_p13 = scmp.ne.s32.totalorder %s736_s0, %s438_s27  ;;  %p445_p3 = scmp.lt.u32.totalorder %s438_s27, %s736_s0 }
  0x12   : > { %p628_p12 = pnand %p739_p10, %p386_p11 }
  0x14   : > { %p440_p0 = pneg %p628_p12 }
  0x16   : > { %p441_p1 = pnand %p440_p0, %p439_p13 }
  0x18   : > { %p442_p2 = pneg %p441_p1 }
  0x1a   : > { %p447_p4 = pnand %p445_p3, %p442_p2 }
  0x1c   : > { %450 = shalt.err (!%p447_p4)
}
  0x1d   : > { %s552_s4 = smov [#allocation2]   ;;  %s451_s14 = scalar_lea.hbm %s737_s1, 864 }
  0x1e   : > { %389 = dma.hbm_to_smem (!%p628_p12), %s736_s0, 16, %s552_s4, [#allocation5]  }
  0x1f   : > { %p452_p7 = scmp.ne.s32.totalorder %s737_s1, %s451_s14  ;;  %p458_p13 = scmp.lt.u32.totalorder %s451_s14, %s737_s1 }
  0x21   : > { %p454_p8 = pnand %p452_p7, %p440_p0 }
  0x23   : > { %p455_p11 = pneg %p454_p8 }
  0x25   : > { %p460_p1 = pnand %p458_p13, %p455_p11 }
  0x27   : > { %463 = shalt.err (!%p460_p1)
}
  0x28   : > { %s464_s26 = scalar_lea.vmem %s632_s23, 864  ;;  %p472_p10 = scmp.lt.s32.totalorder %s632_s23, %s632_s23 }
  0x29   : > { %p465_p2 = scmp.ne.s32.totalorder %s632_s23, %s464_s26  ;;  %p473_p7 = scmp.lt.s32.totalorder %s464_s26, %s464_s26 }
  0x2b   : > { %p467_p3 = pnand %p465_p2, %p440_p0  ;;  %p474_p8 = por %p473_p7, %p472_p10 }
  0x2d   : > { %p468_p4 = pneg %p467_p3 }
  0x2f   : > { %p475_p6 = pnand %p474_p8, %p468_p4 }
  0x31   : > { %478 = shalt.err (!%p475_p6)
}
  0x32   : > { %s553_s27 = smov 32   ;;  %s554_s28 = smov 2  }
  0x33   : > { %392 = dma.hbm_to_vmem [thread:$0]  (!%p628_p12), %s737_s1, 864, %s632_s23, [#allocation3], %s553_s27, %s553_s27, %s554_s28  }
  0x34   : > { %127 = sbr.rel (%p619_p9) target bundleno = 123 (0x7b), region = 28  ;;  %p744_p0 = scmp.eq.s32.totalorder (!%p619_p9), %s592_s13, 0 }
  0x3b   : > { %524 = dma.done.wait (%p744_p0), [#allocation5], 16   ;;  %p745_p11 = pmov %p744_p0 }
  0x3c   : > { %p746_p6 = pmov %p744_p0 }
  0x3d   : > { %526 = vsyncadd (%p745_p11), [#allocation5], 4294967280 }
  0x3e   : > { %528 = dma.done.wait (%p746_p6), [#allocation3], 864   ;;  %p747_p10 = pmov %p744_p0 }
  0x40   : > { %530 = vsyncadd (%p747_p10), [#allocation3], 4294966432 }
  0x41   : > { %137 = sfence }
  0x42   : > { %s149_s24 = sld [smem:[#allocation2 + %s592_s13]]  ;;  %v150_v0 = vld [vmem:[#allocation6] sm:$0x3]  ;;  %v152_v1 = vld [vmem:[#allocation6 + $0x28] sm:$0x3]  ;;  %s146_s21 = sand.u32 1, %s541_s10  }
  0x43   : > { %v153_v2 = vsub.f32 %v150_v0, %v152_v1  ;;  %v155_v3 = vld [vmem:[#allocation6 + $0x2] sm:$0x3]  ;;  %v157_v4 = vld [vmem:[#allocation6 + $0x2a] sm:$0x3]  ;;  %v164_v6 = vld [vmem:[#allocation6 + $0x4] sm:$0x3] }
  0x44   : > { %v158_v5 = vsub.f32 %v155_v3, %v157_v4  ;;  %v167_v8 = vld [vmem:[#allocation6 + $0x6] sm:$0x3]  ;;  %v175_v9 = vld [vmem:[#allocation6 + $0xa] sm:$0x3]  ;;  %v160_v10 = vld [vmem:[#allocation6 + $0x2c] sm:$0x3] }
  0x45   : > { %v165_v7 = vmul.f32 %v164_v6, %v153_v2  ;;  %v176_v12 = vmul.f32 %v175_v9, %v153_v2  ;;  %v178_v13 = vld [vmem:[#allocation6 + $0xc] sm:$0x3]  ;;  %v186_v14 = vld [vmem:[#allocation6 + $0x10] sm:$0x3]  ;;  %v189_v17 = vld [vmem:[#allocation6 + $0x12] sm:$0x3] }
  0x46   : > { %v168_v11 = vmul.f32 %v167_v8, %v158_v5  ;;  %v179_v15 = vmul.f32 %v178_v13, %v158_v5  ;;  %v187_v16 = vmul.f32 %v186_v14, %v153_v2  ;;  %v171_v19 = vld [vmem:[#allocation6 + $0x8] sm:$0x3]  ;;  %v182_v20 = vld [vmem:[#allocation6 + $0xe] sm:$0x3]  ;;  %v190_v21 = vmul.f32 %v189_v17, %v158_v5  ;;  %v193_v22 = vld [vmem:[#allocation6 + $0x14] sm:$0x3] }
  0x47   : > { %v199_v33 = vld [vmem:[#allocation6 + $0x16] sm:$0x3]  ;;  %v206_v34 = vld [vmem:[#allocation6 + $0x1a] sm:$0x3]  ;;  %v220_v35 = vld [vmem:[#allocation6 + $0x20] sm:$0x3] }
  0x48   : > { %v161_v18 = vstv %s149_s24  ;;  %v169_v24 = vadd.f32 %v168_v11, %v165_v7  ;;  %v180_v25 = vadd.f32 %v179_v15, %v176_v12  ;;  %v191_v26 = vadd.f32 %v190_v21, %v187_v16  ;;  %v202_v36 = vld [vmem:[#allocation6 + $0x18] sm:$0x3]  ;;  %v213_v37 = vld [vmem:[#allocation6 + $0x1c] sm:$0x3]  ;;  %v216_v38 = vld [vmem:[#allocation6 + $0x1e] sm:$0x3] }
  0x49   : > { %v162_v23 = vsub.f32 %v161_v18, %v160_v10  ;;  %v227_v41 = vld [vmem:[#allocation6 + $0x22] sm:$0x3]  ;;  %v230_v42 = vld [vmem:[#allocation6 + $0x24] sm:$0x3]  ;;  %v234_v43 = vld [vmem:[#allocation6 + $0x26] sm:$0x3] }
  0x4a   : > { %v210_v55 = vld [vmem:[#allocation6 + $0x2e] sm:$0x3]  ;;  %v224_v56 = vld [vmem:[#allocation6 + $0x30] sm:$0x3]  ;;  %v238_v60 = vld [vmem:[#allocation6 + $0x32] sm:$0x3] }
  0x4b   : > { %v172_v27 = vmul.f32 %v171_v19, %v162_v23  ;;  %v183_v28 = vmul.f32 %v182_v20, %v162_v23  ;;  %v194_v29 = vmul.f32 %v193_v22, %v162_v23  ;;  %v259_v0 = vld [vmem:[#allocation6 + $0x34] sm:$0x3]  ;;  %s360_s23 = sshll.u32 %s146_s21, 1  ;;  %s365_s5 = sshll.u32 %s592_s13, 5 }
  0x4c   : > { %v374_v5 = vtrunc.f32 %v259_v0  ;;  %s148_s3 = scalar_lea.vmem [#allocation7], %s360_s23  ;;  %s696_s8 = scalar_lea.hbm %s738_s2, %s365_s5 }
  0x4d   : > { %v173_v30 = vadd.f32 %v172_v27, %v169_v24  ;;  %v184_v31 = vadd.f32 %v183_v28, %v180_v25  ;;  %v195_v32 = vadd.f32 %v194_v29, %v191_v26  ;;  %s282_s4 = sshll.u32 %s148_s3, 4  ;;  %s269_s14 = scalar_lea.sflag [#allocation4], %s146_s21  ;;  %s691_s4 = int_to_ptr.vmem [resolvable:$true] %s282_s4 }
  0x4e   : > { %v375_v12 = vcvt.f32.s32 %v374_v5  ;;  %s479_s16 = scalar_lea.vmem %s691_s4, 32  ;;  %s555_s13 = smov [#allocation7]  }
  0x4f   : > { %v196_v39 = vmul.f32 %v195_v32, %v173_v30  ;;  %v197_v40 = vmul.f32 %v195_v32, %v184_v31  ;;  %v207_v44 = vmul.f32 %v206_v34, %v195_v32  ;;  %v221_v45 = vmul.f32 %v220_v35, %v195_v32  ;;  %p480_p9 = scmp.ne.s32.totalorder %s691_s4, %s479_s16  ;;  %s483_s17 = sshll.u32 %s555_s13, 4  ;;  %s484_s17 = int_to_ptr.vmem [resolvable:$false] %s483_s17 }
  0x50   : > { %v235_v52 = vmul.f32 %v234_v43, %v195_v32  ;;  %s485_s22 = scalar_lea.vmem %s484_s17, 64  ;;  %p486_p1 = scmp.lt.s32.totalorder %s691_s4, %s484_s17 }
  0x51   : > { %v200_v46 = vmul.f32 %v199_v33, %v196_v39  ;;  %v203_v47 = vmul.f32 %v202_v36, %v197_v40  ;;  %v214_v48 = vmul.f32 %v213_v37, %v196_v39  ;;  %v217_v49 = vmul.f32 %v216_v38, %v197_v40  ;;  %p481_p12 = pnand %p480_p9, %p609_p5  ;;  %p487_p2 = scmp.lt.s32.totalorder %s485_s22, %s479_s16 }
  0x52   : > { %v228_v50 = vmul.f32 %v227_v41, %v196_v39  ;;  %v231_v51 = vmul.f32 %v230_v42, %v197_v40 }
  0x53   : > { %v204_v53 = vadd.f32 %v203_v47, %v200_v46  ;;  %v218_v54 = vadd.f32 %v217_v49, %v214_v48  ;;  %p482_p13 = pneg %p481_p12  ;;  %p488_p3 = por %p487_p2, %p486_p1 }
  0x54   : > { %v232_v57 = vadd.f32 %v231_v51, %v228_v50 }
  0x55   : > { %v208_v58 = vadd.f32 %v207_v44, %v204_v53  ;;  %v222_v59 = vadd.f32 %v221_v45, %v218_v54  ;;  %p489_p4 = pnand %p488_p3, %p482_p13 }
  0x56   : > { %v236_v61 = vadd.f32 %v235_v52, %v232_v57 }
  0x57   : > { %v211_v62 = vadd.f32 %v210_v55, %v208_v58  ;;  %v225_v63 = vadd.f32 %v224_v56, %v222_v59 }
  0x58   : > { %v239_v1 = vadd.f32 %v238_v60, %v236_v61 }
  0x59   : > { %v361_v2 = vadd.f32 8.0, %v211_v62  ;;  %v362_v3 = vadd.f32 8.0, %v225_v63 }
  0x5a   : > { %v363_v4 = vadd.f32 10.0, %v239_v1 }
  0x5b   : > { %v368_v6 = vtrunc.f32 %v361_v2  ;;  %v370_v7 = vtrunc.f32 %v362_v3 }
  0x5c   : > { %v245_v8 = vmul.f32 0.05, %v363_v4 }
  0x5d   : > { %v369_v9 = vcvt.f32.s32 %v368_v6  ;;  %v371_v10 = vcvt.f32.s32 %v370_v7 }
  0x5e   : > { %v372_v11 = vtrunc.f32 %v245_v8 }
  0x5f   : > { %vm247_vm0 = vcmp.ge.s32.totalorder %v369_v9, 0  ;;  %vm248_vm1 = vcmp.lt.s32.totalorder %v369_v9, 16  ;;  %vm250_vm2 = vcmp.ge.s32.totalorder %v371_v10, 0  ;;  %vm252_vm4 = vcmp.lt.s32.totalorder %v371_v10, 16 }
  0x60   : > { %v373_v13 = vcvt.f32.s32 %v372_v11  ;;  %vm249_vm3 = vmand %vm247_vm0, %vm248_vm1 }
  0x61   : > { %vm251_vm5 = vmand %vm249_vm3, %vm250_vm2 }
  0x62   : > { %v261_v14 = vadd.s32 %v375_v12, %v373_v13  ;;  %vm253_vm6 = vmand %vm251_vm5, %vm252_vm4  ;;  %vm254_vm7 = vcmp.ge.s32.totalorder %v373_v13, 0  ;;  %vm256_vm9 = vcmp.lt.s32.totalorder %v373_v13, 1 }
  0x63   : > { %vm255_vm8 = vmand %vm253_vm6, %vm254_vm7 }
  0x64   : > { %v262_v15 = vmul.u32 16, %v261_v14  ;;  %vm257_vm10 = vmand %vm255_vm8, %vm256_vm9 }
  0x66   : > { %v263_v16 = vadd.s32 %v369_v9, %v262_v15 }
  0x68   : > { %v264_v17 = vmul.u32 16, %v263_v16 }
  0x6a   : > { %v265_v18 = vadd.s32 %v371_v10, %v264_v17 }
  0x6c   : > { %v266_v19 = vsel %vm257_vm10, %v265_v18, 4294967295 }
  0x6d   : > { %267 = vst [vmem:[%s148_s3] sm:$0x3] %v266_v19 }
  0x6e   : > { %492 = shalt.err (!%p489_p4)
}
  0x6f   : > { %s493_s25 = scalar_lea.hbm %s696_s8, 32  ;;  %s497_s28 = scalar_lea.hbm %s738_s2, 128 }
  0x70   : > { %p494_p7 = scmp.ne.s32.totalorder %s696_s8, %s493_s25  ;;  %p498_p11 = scmp.lt.u32.totalorder %s696_s8, %s738_s2 }
  0x71   : > { %p499_p6 = scmp.lt.u32.totalorder %s497_s28, %s493_s25  ;;  %p501_p9 = scmp.lt.u32.totalorder %s493_s25, %s696_s8 }
  0x72   : > { %p495_p8 = pnand %p494_p7, %p609_p5 }
  0x73   : > { %p500_p10 = por %p499_p6, %p498_p11 }
  0x74   : > { %p496_p0 = pneg %p495_p8 }
  0x75   : > { %p502_p12 = por %p501_p9, %p500_p10 }
  0x77   : > { %p503_p13 = pnand %p502_p12, %p496_p0 }
  0x79   : > { %506 = shalt.err (!%p503_p13)
}
  0x7a   : > { %384 = dma.vmem_to_hbm [thread:$0]  (%p609_p5), %s691_s4, 32, %s696_s8, %s269_s14  }
  0x7b PF: > { %p401_p1 = scmp.ge.s32.totalorder %s549_s12, 2  ;;  %s294_s24 = sand.u32 1, %s537_s9  }
  0x7c   : > { %p748_p2 = scmp.ne.s32.totalorder %s741_s20, 0  ;;  %s295_s21 = scalar_lea.sflag [#allocation4], %s294_s24 }
  0x7e   : > { %p394_p3 = pnand %p401_p1, %p748_p2 }
  0x80   : > { %532 = dma.done.wait (!%p394_p3), %s295_s21, 32  }
  0x81   : > { %534 = vsyncadd (!%p394_p3), %s295_s21, 4294967264  ;;  %p14_p4 = scmp.ge.s32.totalorder %s596_s15, 6   ;;  %s749_s9 = smov %s541_s10 }
  0x82   : > { %s750_s10 = smov %s545_s11  ;;  %s751_s11 = smov %s607_s18 }
  0x83   : > { %s752_s12 = smov %s596_s15  ;;  %16 = sbr.rel (!%p14_p4) target bundleno = 5 (0x5), region = 96 }
  0x8a   :  { %300 = vsyncpa [#allocation3], 1 }
  0x8b   :  { %302 = vsyncpa [#allocation3 + $0x1], 1 }
  0x8c   :  { %303 = vsyncpa [#allocation4], 1 }
  0x8d   :  { %305 = vsyncpa [#allocation4 + $0x1], 1 }
  0x8e   :  { %306 = vsyncpa [#allocation5], 1 }
  0x8f   :  { %308 = vsyncpa [#allocation5 + $0x1], 1 }

</bundles_post_ra>
